<compile_context>
chip_gen: v7x
topology: tpu7x:2x2x1
jax: 0.10.0
libtpu: 0.0.40
codegen_flags: <defaults>
</compile_context>

<pallas_src>
import functools

import jax
import jax.numpy as jnp
from jax import lax
from jax.experimental import pallas as pl
from jax.experimental.pallas import tpu as pltpu


def _onehot_score_kernel(uid_ref, aid_ref, u_tabT_ref, a_tabT_ref, o_ref, *,
                         num_users, num_animes):
    """Scores one tile of b_tile (user, anime) pairs.

    uid_ref / aid_ref : (1, b_tile) int32 id vectors for this tile (VMEM).
    u_tabT_ref        : (E, num_users)  transposed user table, VMEM resident.
    a_tabT_ref        : (E, num_animes) transposed anime table, VMEM resident.
    o_ref             : (1, b_tile) lane-dense output slab for this tile.
    """
    uid = uid_ref[...]                      # (1, b_tile)
    aid = aid_ref[...]                      # (1, b_tile)
    b_tile = uid.shape[-1]

    # One-hot selection matrices: table row index on sublanes, batch on lanes.
    #   onehot[n, i] = (ids[i] == n)
    u_iota = lax.broadcasted_iota(jnp.int32, (num_users, b_tile), 0)
    a_iota = lax.broadcasted_iota(jnp.int32, (num_animes, b_tile), 0)
    u_onehot = (u_iota == uid).astype(u_tabT_ref.dtype)    # (num_users,  b_tile)
    a_onehot = (a_iota == aid).astype(a_tabT_ref.dtype)    # (num_animes, b_tile)

    # MXU gather: (E, N) @ (N, b_tile) -> (E, b_tile); batch stays lane-dense,
    # accumulation happens in f32 (exact for 0/1 one-hot coefficients).
    u_cols = jnp.dot(u_tabT_ref[...], u_onehot,
                     preferred_element_type=jnp.float32)   # (E, b_tile)
    a_cols = jnp.dot(a_tabT_ref[...], a_onehot,
                     preferred_element_type=jnp.float32)   # (E, b_tile)

    # Dot-product score per pair: reduce the small E axis over sublanes,
    # leaving a dense (1, b_tile) lane-major result for an unmasked store.
    o_ref[...] = jnp.sum(u_cols * a_cols, axis=0, keepdims=True).astype(o_ref.dtype)


def _vmem_capacity_bytes():
    """Per-core VMEM capacity; conservative fallback if the query is unavailable."""
    try:
        return int(pltpu.get_tpu_info().vmem_capacity_bytes)
    except Exception:
        return 64 * 1024 * 1024   # v7x per-TensorCore VMEM (smallest generation)


def emb_only_collab_scores(user_ids, anime_ids, user_table, anime_table,
                           *, b_tile=512):
    """user_ids, anime_ids: int (B,). Tables: (N, E). Returns (B,) float32."""
    B = int(user_ids.shape[0])
    num_users, emb = user_table.shape
    num_animes, emb_a = anime_table.shape
    assert emb == emb_a, "user/anime embedding sizes must match"

    # Don't over-pad tiny batches; keep tiles a multiple of 128 lanes (512 by
    # default so the one-hot gather fills a full 256-wide MXU pass on v6e/v7x).
    b_tile = int(min(b_tile, 128 * pl.cdiv(max(B, 1), 128)))
    b_tile = max(b_tile, 128)

    num_tiles = int(pl.cdiv(B, b_tile))
    b_pad = num_tiles * b_tile

    # --- Generation-aware VMEM budgeting ---------------------------------
    tab_itemsize = jnp.dtype(user_table.dtype).itemsize
    table_bytes = (user_table.size + anime_table.size) * tab_itemsize
    # Default BlockSpec pipelining double-buffers every input block; also
    # account for the in-kernel one-hot / gathered-column intermediates.
    needed = (2 * table_bytes                              # tables (x2 buffers)
              + 2 * 2 * b_tile * 4                         # two id inputs (x2 buffers)
              + 2 * b_tile * 4                             # output slab (x2 buffers)
              + (num_users + num_animes + 2 * emb) * b_tile * 4)  # intermediates
    vmem_cap = _vmem_capacity_bytes()
    if needed > int(0.4 * vmem_cap):
        # TODO(synk): chunked HBM-gather fallback (memory_space=pl.ANY + per-row
        # async DMAs into double-buffered scratch) for tables too big for VMEM.
        raise ValueError(
            "Embedding tables too large for the VMEM-resident fast path; "
            "use a chunked HBM-gather kernel instead.")
    vmem_limit = int(min(0.85 * vmem_cap, max(2 * needed, 32 * 1024 * 1024)))

    # Clamp (PyTorch nn.Embedding would raise on OOB ids; we clamp) and pad to
    # a whole number of tiles; padded ids score row 0 and are sliced off below.
    uid = jnp.clip(user_ids.astype(jnp.int32), 0, num_users - 1)
    aid = jnp.clip(anime_ids.astype(jnp.int32), 0, num_animes - 1)
    uid = jnp.pad(uid, (0, b_pad - B)).reshape(1, b_pad)
    aid = jnp.pad(aid, (0, b_pad - B)).reshape(1, b_pad)

    # Pre-transpose tables so gathered embeddings land as (E, batch):
    # batch on lanes (dense vregs), E on sublanes.
    u_tabT = user_table.T          # (E, num_users)
    a_tabT = anime_table.T         # (E, num_animes)

    grid_spec = pltpu.PrefetchScalarGridSpec(
        num_scalar_prefetch=0,
        grid=(num_tiles,),
        in_specs=[
            pl.BlockSpec((1, b_tile), lambda t: (0, t)),           # user ids
            pl.BlockSpec((1, b_tile), lambda t: (0, t)),           # anime ids
            pl.BlockSpec((emb, num_users), lambda t: (0, 0)),      # user table^T (resident)
            pl.BlockSpec((emb, num_animes), lambda t: (0, 0)),     # anime table^T (resident)
        ],
        out_specs=pl.BlockSpec((1, b_tile), lambda t: (0, t)),
    )

    out = pl.pallas_call(
        functools.partial(_onehot_score_kernel,
                          num_users=num_users, num_animes=num_animes),
        out_shape=jax.ShapeDtypeStruct((1, b_pad), jnp.float32),
        grid_spec=grid_spec,
        compiler_params=pltpu.CompilerParams(
            dimension_semantics=("parallel",),
            vmem_limit_bytes=vmem_limit,
        ),
    )(uid, aid, u_tabT, a_tabT)

    return out.reshape(-1)[:B]


def xavier_uniform(key, shape, dtype=jnp.float32):
    # torch.nn.init.xavier_uniform_ on nn.Embedding weight (num_embeddings, emb):
    # bound = sqrt(6 / (fan_in + fan_out)) = sqrt(6 / (shape[0] + shape[1]))
    bound = (6.0 / (shape[0] + shape[1])) ** 0.5
    return jax.random.uniform(key, shape, dtype=dtype, minval=-bound, maxval=bound)


if __name__ == "__main__":
    num_users, num_animes, emb_size = 64, 128, 32
    batch = 8

    key = jax.random.PRNGKey(0)
    k_u, k_a, k_uid, k_aid = jax.random.split(key, 4)

    user_table = xavier_uniform(k_u, (num_users, emb_size))
    anime_table = xavier_uniform(k_a, (num_animes, emb_size))

    user_ids = jax.random.randint(k_uid, (batch,), 0, num_users, dtype=jnp.int32)
    anime_ids = jax.random.randint(k_aid, (batch,), 0, num_animes, dtype=jnp.int32)

    scores = emb_only_collab_scores(user_ids, anime_ids, user_table, anime_table)
    scores = jax.block_until_ready(scores)

    # Pure-JAX reference for sanity.
    ref = jnp.sum(user_table[user_ids] * anime_table[anime_ids], axis=1)
    assert scores.shape == (batch,)
    assert jnp.allclose(scores, ref, atol=1e-5, rtol=1e-5)

    print("KERNEL_OK")
</pallas_src>

<mosaic_0001>
module attributes {stable_mosaic.version = 11 : i64} {
  func.func @_onehot_score_kernel(%arg0: i32, %arg1: memref<1x128xi32, #tpu.memory_space<vmem>>, %arg2: memref<1x128xi32, #tpu.memory_space<vmem>>, %arg3: memref<32x64xf32, #tpu.memory_space<vmem>>, %arg4: memref<32x128xf32, #tpu.memory_space<vmem>>, %arg5: memref<1x128xf32, #tpu.memory_space<vmem>>) attributes {dimension_semantics = [#tpu.dimension_semantics<parallel>], iteration_bounds = array<i64: 1>, scalar_prefetch = 0 : i64, scratch_operands = 0 : i64, tpu.core_type = #tpu.core_type<tc>, window_params = [{transform_indices = @transform_0, window_bounds = array<i64: 1, 128>}, {transform_indices = @transform_1, window_bounds = array<i64: 1, 128>}, {pipeline_mode = #tpu.pipeline_mode<synchronous>, transform_indices = @transform_2, window_bounds = array<i64: 32, 64>}, {pipeline_mode = #tpu.pipeline_mode<synchronous>, transform_indices = @transform_3, window_bounds = array<i64: 32, 128>}, {transform_indices = @transform_4, window_bounds = array<i64: 1, 128>}]} {
    %c0 = arith.constant 0 : index
    %c0_0 = arith.constant 0 : index
    %0 = vector.load %arg1[%c0, %c0_0] : memref<1x128xi32, #tpu.memory_space<vmem>>, vector<1x128xi32>
    %c0_1 = arith.constant 0 : index
    %c0_2 = arith.constant 0 : index
    %1 = vector.load %arg2[%c0_1, %c0_2] : memref<1x128xi32, #tpu.memory_space<vmem>>, vector<1x128xi32>
    %2 = tpu.iota {dimensions = array<i32: 0>} : vector<64x128xi32>
    %3 = tpu.iota {dimensions = array<i32: 0>} : vector<128x128xi32>
    %4 = vector.broadcast %0 : vector<1x128xi32> to vector<64x128xi32>
    %5 = arith.cmpi eq, %2, %4 : vector<64x128xi32>
    %6 = arith.extui %5 : vector<64x128xi1> to vector<64x128xi32>
    %7 = arith.sitofp %6 : vector<64x128xi32> to vector<64x128xf32>
    %8 = vector.broadcast %1 : vector<1x128xi32> to vector<128x128xi32>
    %9 = arith.cmpi eq, %3, %8 : vector<128x128xi32>
    %10 = arith.extui %9 : vector<128x128xi1> to vector<128x128xi32>
    %11 = arith.sitofp %10 : vector<128x128xi32> to vector<128x128xf32>
    %c0_3 = arith.constant 0 : index
    %c0_4 = arith.constant 0 : index
    %12 = vector.load %arg3[%c0_3, %c0_4] : memref<32x64xf32, #tpu.memory_space<vmem>>, vector<32x64xf32>
    %cst = arith.constant dense<0.000000e+00> : vector<32x128xf32>
    %13 = tpu.matmul %12, %7, %cst {dimension_numbers = #tpu.dot_dimension_numbers<[1], [0], [0], [1], [0, 0, 1, 1], [], []>} : vector<32x64xf32>, vector<64x128xf32>, vector<32x128xf32> -> vector<32x128xf32>
    %c0_5 = arith.constant 0 : index
    %c0_6 = arith.constant 0 : index
    %14 = vector.load %arg4[%c0_5, %c0_6] : memref<32x128xf32, #tpu.memory_space<vmem>>, vector<32x128xf32>
    %cst_7 = arith.constant dense<0.000000e+00> : vector<32x128xf32>
    %15 = tpu.matmul %14, %11, %cst_7 {dimension_numbers = #tpu.dot_dimension_numbers<[1], [0], [0], [1], [0, 0, 1, 1], [], []>} : vector<32x128xf32>, vector<128x128xf32>, vector<32x128xf32> -> vector<32x128xf32>
    %16 = arith.mulf %13, %15 : vector<32x128xf32>
    %cst_8 = arith.constant dense<0.000000e+00> : vector<128xf32>
    %17 = vector.multi_reduction <add>, %16, %cst_8 [0] : vector<32x128xf32> to vector<128xf32>
    %18 = vector.shape_cast %17 : vector<128xf32> to vector<1x128xf32>
    %c0_9 = arith.constant 0 : index
    %c0_10 = arith.constant 0 : index
    %19 = vector.load %arg5[%c0_9, %c0_10] : memref<1x128xf32, #tpu.memory_space<vmem>>, vector<1x128xf32>
    tpu.vector_store %arg5[%c0_9, %c0_10], %18 {strides = array<i32>} : memref<1x128xf32, #tpu.memory_space<vmem>>, vector<1x128xf32>,
    return
  }
  func.func @transform_0(%arg0: i32) -> (i32, i32) {
    %c0_i32 = arith.constant 0 : i32
    %c0_i32_0 = arith.constant 0 : i32
    return %c0_i32, %arg0 : i32, i32
  }
  func.func @transform_1(%arg0: i32) -> (i32, i32) {
    %c0_i32 = arith.constant 0 : i32
    %c0_i32_0 = arith.constant 0 : i32
    return %c0_i32, %arg0 : i32, i32
  }
  func.func @transform_2(%arg0: i32) -> (i32, i32) {
    %c0_i32 = arith.constant 0 : i32
    %c0_i32_0 = arith.constant 0 : i32
    %c0_i32_1 = arith.constant 0 : i32
    return %c0_i32, %c0_i32_0 : i32, i32
  }
  func.func @transform_3(%arg0: i32) -> (i32, i32) {
    %c0_i32 = arith.constant 0 : i32
    %c0_i32_0 = arith.constant 0 : i32
    %c0_i32_1 = arith.constant 0 : i32
    return %c0_i32, %c0_i32_0 : i32, i32
  }
  func.func @transform_4(%arg0: i32) -> (i32, i32) {
    %c0_i32 = arith.constant 0 : i32
    %c0_i32_0 = arith.constant 0 : i32
    return %c0_i32, %arg0 : i32, i32
  }
}

</mosaic_0001>

<bundles_post_ra>
// kernel: tpu_custom_call.1
= control target key start
LH: loop header
LB: loop body
LE: loop exit
PB: predicated region body
PF: predicated region fallthrough
CT: control target
= control target key end

     0   :  { %9 = vsyncpa [#allocation3], 0  ;;  %s866_s0 = inlined_call_operand.hbm [shape: s32[1,128], index: 0, kind: input, shape index: {}]   ;;  %s867_s1 = inlined_call_operand.vmem [shape: s32[1,128], index: 1, kind: input, shape index: {}]   ;;  %s868_s2 = inlined_call_operand.hbm [shape: f32[32,64], index: 2, kind: input, shape index: {}]   ;;  %s869_s3 = inlined_call_operand.hbm [shape: f32[32,128], index: 3, kind: input, shape index: {}]   ;;  %s870_s4 = inlined_call_operand.hbm [shape: f32[1,128], index: 4, kind: output, shape index: {}]  }
   0x1   :  { %10 = vsyncpa [#allocation6], 0 }
   0x2   :  { %11 = vsyncpa [#allocation4], 0  ;;  %s672_s15 = smov [#allocation5]   ;;  %s578_s19 = scalar_lea.hbm %s868_s2, 512 }
   0x3   :  { %s29_s16 = sshll.u32 %s672_s15, 4  ;;  %p579_p0 = scmp.ne.s32.totalorder %s868_s2, %s578_s19  ;;  %s30_s16 = int_to_ptr.vmem [resolvable:$true] %s29_s16 }
   0x4   :  { %p582_p1 = scmp.lt.u32.totalorder %s578_s19, %s868_s2 }
   0x6   :  { %p584_p2 = pnand %p582_p1, %p579_p0 }
   0x8   :  { %587 = shalt.err (!%p584_p2)
}
   0x9   :  { %s588_s24 = scalar_lea.vmem %s30_s16, 512  ;;  %p593_p4 = scmp.lt.s32.totalorder %s30_s16, %s30_s16 }
   0xa   :  { %p589_p3 = scmp.ne.s32.totalorder %s30_s16, %s588_s24  ;;  %p594_p5 = scmp.lt.s32.totalorder %s588_s24, %s588_s24 }
   0xc   :  { %p595_p6 = por %p594_p5, %p593_p4 }
   0xe   :  { %p596_p7 = pnand %p595_p6, %p589_p3 }
  0x10   :  { %599 = shalt.err (!%p596_p7)
}
  0x11   :  { %s673_s25 = smov 128   ;;  %s674_s26 = smov 8  }
  0x12   :  { %35 = dma.hbm_to_vmem [thread:$0]  %s868_s2, 512, %s30_s16, [#allocation6], %s673_s25, %s673_s25, %s674_s26  }
  0x13   :  { %s675_s29 = smov [#allocation2]   ;;  %s676_s5 = smov [#allocation7]  }
  0x14   :  { %s18_s30 = sshll.u32 %s675_s29, 4  ;;  %s41_s6 = sshll.u32 %s676_s5, 4  ;;  %s19_s30 = int_to_ptr.vmem [resolvable:$true] %s18_s30  ;;  %s42_s6 = int_to_ptr.vmem [resolvable:$true] %s41_s6 }
  0x15   :  { %s600_s9 = scalar_lea.hbm %s866_s0, 16 }
  0x16   :  { %p601_p8 = scmp.ne.s32.totalorder %s866_s0, %s600_s9  ;;  %p604_p9 = scmp.lt.u32.totalorder %s600_s9, %s866_s0 }
  0x18   :  { %p606_p10 = pnand %p604_p9, %p601_p8 }
  0x1a   :  { %609 = shalt.err (!%p606_p10)
}
  0x1b   :  { %s610_s2 = scalar_lea.vmem %s19_s30, 16  ;;  %s614_s14 = scalar_lea.vmem %s19_s30, 32 }
  0x1c   :  { %p611_p11 = scmp.ne.s32.totalorder %s19_s30, %s610_s2  ;;  %p615_p12 = scmp.lt.s32.totalorder %s19_s30, %s19_s30 }
  0x1d   :  { %p616_p13 = scmp.lt.s32.totalorder %s614_s14, %s610_s2 }
  0x1f   :  { %p617_p0 = por %p616_p13, %p615_p12 }
  0x21   :  { %p618_p1 = pnand %p617_p0, %p611_p11 }
  0x23   :  { %621 = shalt.err (!%p618_p1)
}
  0x24   :  { %21 = dma.hbm_to_vmem [thread:$0]  %s866_s0, 16, %s19_s30, [#allocation3]  }
  0x25   :  { %s622_s19 = scalar_lea.hbm %s869_s3, 512 }
  0x26   :  { %p623_p2 = scmp.ne.s32.totalorder %s869_s3, %s622_s19  ;;  %p626_p3 = scmp.lt.u32.totalorder %s622_s19, %s869_s3 }
  0x28   :  { %p628_p4 = pnand %p626_p3, %p623_p2 }
  0x2a   :  { %631 = shalt.err (!%p628_p4)
}
  0x2b   :  { %s632_s24 = scalar_lea.vmem %s42_s6, 512  ;;  %p637_p6 = scmp.lt.s32.totalorder %s42_s6, %s42_s6 }
  0x2c   :  { %p633_p5 = scmp.ne.s32.totalorder %s42_s6, %s632_s24  ;;  %p638_p7 = scmp.lt.s32.totalorder %s632_s24, %s632_s24 }
  0x2e   :  { %p639_p8 = por %p638_p7, %p637_p6 }
  0x30   :  { %p640_p9 = pnand %p639_p8, %p633_p5 }
  0x32   :  { %643 = shalt.err (!%p640_p9)
}
  0x33   :  { %47 = dma.hbm_to_vmem [thread:$0]  %s869_s3, 512, %s42_s6, [#allocation6], %s673_s25, %s673_s25, %s674_s26  }
  0x34   :  { %666 = dma.done.wait [#allocation3], 16  }
  0x35   :  { %667 = vsyncadd [#allocation3], 4294967280 }
  0x36   :  { %668 = dma.done.wait [#allocation6], 1024  }
  0x37   :  { %669 = vsyncadd [#allocation6], 4294966272  ;;  %v59_v0 = vlaneseq  ;;  %vm160_vm0 = vcmask 523264   ;;  %v756_v7 = vld [vmem:[%s867_s1] ss:$0 sm:$0xff]  ;;  %v156_v9 = vld [vmem:[#allocation5] sm:$0xff] }
  0x38   :  { %v377_v8 = vld [vmem:[#allocation2] ss:$0 sm:$0xff]  ;;  %479 = vmatprep.mubr.msk.f32.mxu0 %vm160_vm0, %v156_v9  ;;  %v677_v12 = vmov 1.0|1.0   ;;  %v258_v14 = vld [vmem:[#allocation7] sm:$0xff]  ;;  %v157_v27 = vld [vmem:[#allocation5 + $0x8] sm:$0xff] }
  0x39   :  { %v746_v1 = vshrl.u32 %v59_v0, 7  ;;  %517 = vmatprep.mubr.f32.mxu1 %v258_v14  ;;  %v158_v28 = vld [vmem:[#allocation5 + $0x10] sm:$0xff]  ;;  %v159_v29 = vld [vmem:[#allocation5 + $0x18] sm:$0xff]  ;;  %v259_v30 = vld [vmem:[#allocation7 + $0x8] sm:$0xff]  ;;  %s678_s1 = smov [#allocation8]  }
  0x3a   :  { %v260_v31 = vld [vmem:[#allocation7 + $0x10] sm:$0xff]  ;;  %v261_v32 = vld [vmem:[#allocation7 + $0x18] sm:$0xff]  ;;  %s367_s25 = sshll.u32 %s678_s1, 4  ;;  %s368_s25 = int_to_ptr.vmem [resolvable:$true] %s367_s25 }
  0x3b   :  { %v61_v2 = vadd.s32 8, %v746_v1  ;;  %v62_v3 = vadd.s32 16, %v746_v1  ;;  %v63_v4 = vadd.s32 24, %v746_v1  ;;  %v64_v5 = vadd.s32 32, %v746_v1  ;;  %s644_s26 = scalar_lea.vmem %s368_s25, 16  ;;  %s648_s29 = scalar_lea.vmem %s368_s25, 32 }
  0x3c   :  { %v65_v6 = vadd.s32 40, %v746_v1  ;;  %vm108_vm1 = vcmp.eq.s32.totalorder %v746_v1, %v756_v7  ;;  %v66_v10 = vadd.s32 48, %v746_v1  ;;  %v67_v11 = vadd.s32 56, %v746_v1  ;;  %p645_p10 = scmp.ne.s32.totalorder %s368_s25, %s644_s26  ;;  %p649_p11 = scmp.lt.s32.totalorder %s368_s25, %s368_s25 }
  0x3d   :  { %vm109_vm2 = vcmp.eq.s32.totalorder %v61_v2, %v756_v7  ;;  %vm110_vm3 = vcmp.eq.s32.totalorder %v62_v3, %v756_v7  ;;  %vm111_vm4 = vcmp.eq.s32.totalorder %v63_v4, %v756_v7  ;;  %vm112_vm6 = vcmp.eq.s32.totalorder %v64_v5, %v756_v7  ;;  %p650_p12 = scmp.lt.s32.totalorder %s648_s29, %s644_s26 }
  0x3e   :  { %vm539_vm5 = vmpackc.low %vm109_vm2, %vm108_vm1  ;;  %vm113_vm7 = vcmp.eq.s32.totalorder %v65_v6, %v756_v7  ;;  %vm80_vm9 = vcmp.eq.s32.totalorder %v746_v1, %v377_v8  ;;  %vm81_vm10 = vcmp.eq.s32.totalorder %v61_v2, %v377_v8  ;;  %vm82_vm12 = vcmp.eq.s32.totalorder %v62_v3, %v377_v8 }
  0x3f   :  { %540 = vmatprep.subr.msk.bf16.mxu1 %vm539_vm5, %v677_v12  ;;  %vm769_vm8 = vmpackc.low %vm111_vm4, %vm110_vm3  ;;  %vm83_vm13 = vcmp.eq.s32.totalorder %v63_v4, %v377_v8  ;;  %vm114_vm14 = vcmp.eq.s32.totalorder %v66_v10, %v756_v7  ;;  %vm115_vm15 = vcmp.eq.s32.totalorder %v67_v11, %v756_v7  ;;  %v68_v16 = vadd.s32 64, %v746_v1  ;;  %p651_p13 = por %p650_p12, %p649_p11 }
  0x40   :  { %542 = vmatpush3.bf16.msk.msra.mxu1 %vm539_vm5, %v677_v12  ;;  %vm778_vm11 = vmpackc.low %vm113_vm7, %vm112_vm6  ;;  %v69_v17 = vadd.s32 72, %v746_v1  ;;  %vm84_vm2 = vcmp.eq.s32.totalorder %v64_v5, %v377_v8  ;;  %vm85_vm3 = vcmp.eq.s32.totalorder %v65_v6, %v377_v8  ;;  %v70_v20 = vadd.s32 80, %v746_v1 }
  0x41   :  { %544 = vmatprep.subr.msk.bf16.mxu1 %vm769_vm8, %v677_v12  ;;  %vm523_vm1 = vmpackc.low %vm81_vm10, %vm80_vm9  ;;  %vm116_vm6 = vcmp.eq.s32.totalorder %v68_v16, %v756_v7  ;;  %v71_v21 = vadd.s32 88, %v746_v1  ;;  %vm87_vm10 = vcmp.eq.s32.totalorder %v67_v11, %v377_v8  ;;  %v72_v23 = vadd.s32 96, %v746_v1  ;;  %p652_p0 = pnand %p651_p13, %p645_p10 }
  0x42   :  { %524 = vmatprep.subr.msk.bf16.mxu0 %vm523_vm1, %v677_v12  ;;  %vm527_vm4 = vmpackc.low %vm83_vm13, %vm82_vm12  ;;  %vm117_vm7 = vcmp.eq.s32.totalorder %v69_v17, %v756_v7  ;;  %v73_v24 = vadd.s32 104, %v746_v1  ;;  %v74_v25 = vadd.s32 112, %v746_v1  ;;  %v75_v26 = vadd.s32 120, %v746_v1 }
  0x43   :  { %526 = vmatpush3.bf16.msk.msra.mxu0 %vm523_vm1, %v677_v12  ;;  %vm794_vm5 = vmpackc.low %vm115_vm15, %vm114_vm14  ;;  %vm118_vm14 = vcmp.eq.s32.totalorder %v70_v20, %v756_v7  ;;  %vm119_vm15 = vcmp.eq.s32.totalorder %v71_v21, %v756_v7  ;;  %vm120_vm1 = vcmp.eq.s32.totalorder %v72_v23, %v756_v7 }
  0x44   :  { %546 = vmatpush3.bf16.msk.msra.mxu1 %vm769_vm8, %v677_v12  ;;  %528 = vmatprep.subr.msk.bf16.mxu0 %vm527_vm4, %v677_v12  ;;  %vm801_vm9 = vmpackc.low %vm85_vm3, %vm84_vm2  ;;  %vm86_vm8 = vcmp.eq.s32.totalorder %v66_v10, %v377_v8  ;;  %vm121_vm2 = vcmp.eq.s32.totalorder %v73_v24, %v756_v7 }
  0x45   :  { %548 = vmatprep.subr.msk.bf16.mxu1 %vm778_vm11, %v677_v12  ;;  %vm814_vm12 = vmpackc.low %vm117_vm7, %vm116_vm6 }
  0x46   :  { %vm535_vm13 = vmpackc.low %vm87_vm10, %vm86_vm8 }
  0x47   :  { %530 = vmatpush3.bf16.msk.msra.mxu0 %vm527_vm4, %v677_v12  ;;  %vm563_vm3 = vmpackc.low %vm121_vm2, %vm120_vm1  ;;  %vm122_vm4 = vcmp.eq.s32.totalorder %v74_v25, %v756_v7 }
  0x48   :  { %550 = vmatpush3.bf16.msk.msra.mxu1 %vm778_vm11, %v677_v12  ;;  %532 = vmatprep.subr.msk.bf16.mxu0 %vm801_vm9, %v677_v12  ;;  %vm559_vm11 = vmpackc.low %vm119_vm15, %vm118_vm14 }
  0x49   :  { %552 = vmatprep.subr.msk.bf16.mxu1 %vm794_vm5, %v677_v12 }
  0x4b   :  { %534 = vmatpush3.bf16.msk.msra.mxu0 %vm801_vm9, %v677_v12 }
  0x4c   :  { %554 = vmatpush3.bf16.msk.msra.mxu1 %vm794_vm5, %v677_v12  ;;  %536 = vmatprep.subr.msk.bf16.mxu0 %vm535_vm13, %v677_v12  ;;  %vm123_vm5 = vcmp.eq.s32.totalorder %v75_v26, %v756_v7 }
  0x4d   :  { %556 = vmatprep.subr.msk.bf16.mxu1 %vm814_vm12, %v677_v12  ;;  %vm567_vm6 = vmpackc.low %vm123_vm5, %vm122_vm4 }
  0x4f   :  { %538 = vmatpush3.bf16.msk.msra.mxu0 %vm535_vm13, %v677_v12 }
  0x50   :  { %558 = vmatpush3.bf16.msk.msra.mxu1 %vm814_vm12, %v677_v12 }
  0x51   :  { %560 = vmatprep.subr.msk.bf16.mxu1 %vm559_vm11, %v677_v12 }
  0x52   :  { %480 = vmatmul.mubr.msk.f32.vlgmr.msra.gmra.mrb[0].mxu0 %vm160_vm0, %v157_v27 }
  0x53   :  { %482 = vmatprep.mubr.msk.f32.mxu0 %vm160_vm0, %v158_v28 }
  0x54   :  { %562 = vmatpush3.bf16.msk.msra.mxu1 %vm559_vm11, %v677_v12 }
  0x55   :  { %564 = vmatprep.subr.msk.bf16.mxu1 %vm563_vm3, %v677_v12 }
  0x56   :  { %483 = vmatmul.mubr.msk.f32.gmra.mrb[2].mxu0 %vm160_vm0, %v159_v29 }
  0x58   :  { %566 = vmatpush3.bf16.msk.msra.mxu1 %vm563_vm3, %v677_v12 }
  0x59   :  { %568 = vmatprep.subr.msk.bf16.mxu1 %vm567_vm6, %v677_v12 }
  0x5c   :  { %570 = vmatpush3.bf16.msk.msra.mxu1 %vm567_vm6, %v677_v12 }
  0x5f   :  { %518 = vmatmul.mubr.f32.vlgmr.msra.gmra.mrb[0].mxu1 %v259_v30 }
  0x60   :  { %520 = vmatprep.mubr.f32.mxu1 %v260_v31 }
  0x63   :  { %521 = vmatmul.mubr.f32.gmra.mrb[2].mxu1 %v261_v32 }
 0x125   :  { %v481_v33 = vpop.f32.mrb[0].mxu0 }
 0x126   :  { %v239_v34 = vpop.f32.mrb[1].mxu0 }
 0x129   :  { %v484_v35 = vpop.f32.mrb[2].mxu0 }
 0x12a   :  { %v249_v36 = vpop.f32.mrb[3].mxu0 }
 0x132   :  { %v519_v37 = vpop.f32.mrb[0].mxu1 }
 0x133   :  { %v348_v38 = vmul.f32 %v519_v37, %v481_v33  ;;  %v328_v39 = vpop.f32.mrb[1].mxu1 }
 0x134   :  { %v347_v40 = vmul.f32 %v328_v39, %v239_v34 }
 0x136   :  { %v351_v41 = vadd.f32 %v348_v38, %v347_v40  ;;  %v522_v42 = vpop.f32.mrb[2].mxu1 }
 0x137   :  { %v350_v43 = vmul.f32 %v522_v42, %v484_v35  ;;  %v338_v44 = vpop.f32.mrb[3].mxu1 }
 0x138   :  { %v349_v45 = vmul.f32 %v338_v44, %v249_v36 }
 0x13a   :  { %v352_v46 = vadd.f32 %v351_v41, %v349_v45 }
 0x13c   :  { %v353_v47 = vadd.f32 %v352_v46, %v350_v43 }
 0x13e   :  { %v354_v48 = vrot.slane %v353_v47, 4 }
 0x140   :  { %v355_v49 = vadd.f32 %v354_v48, %v353_v47 }
 0x142   :  { %v356_v50 = vrot.slane %v355_v49, 2 }
 0x144   :  { %v357_v51 = vadd.f32 %v356_v50, %v355_v49 }
 0x146   :  { %v358_v52 = vrot.slane %v357_v51, 1 }
 0x148   :  { %v359_v53 = vadd.f32 %v358_v52, %v357_v51 }
 0x14a   :  { %360 = vst [vmem:[#allocation8] sm:$0x1] %v359_v53 }
 0x14b   :  { %655 = shalt.err (!%p652_p0)
}
 0x14c   :  { %s656_s6 = scalar_lea.hbm %s870_s4, 16 }
 0x14d   :  { %p657_p1 = scmp.ne.s32.totalorder %s870_s4, %s656_s6  ;;  %p660_p2 = scmp.lt.u32.totalorder %s656_s6, %s870_s4 }
 0x14f   :  { %p662_p3 = pnand %p660_p2, %p657_p1 }
 0x151   :  { %665 = shalt.err (!%p662_p3)
}
 0x152   :  { %370 = dma.vmem_to_hbm [thread:$0]  %s368_s25, 16, %s870_s4, [#allocation4]  }
 0x153   :  { %670 = dma.done.wait [#allocation4], 16  }
 0x154   :  { %671 = vsyncadd [#allocation4], 4294967280 }
 0x155   :  { %374 = vsyncpa [#allocation3], 1 }
 0x156   :  { %375 = vsyncpa [#allocation6], 1 }
 0x157   :  { %376 = vsyncpa [#allocation4], 1 }

</bundles_post_ra>
